<compile_context>
chip_gen: v5e
topology: v5e:2x2
jax: 0.10.0
libtpu: 0.0.40
codegen_flags: <defaults>
</compile_context>

<pallas_src>
import functools

import jax
import jax.numpy as jnp
from jax.experimental import pallas as pl
from jax.experimental.pallas import tpu as pltpu


def _classifer_kernel(
    x_ref,              # (NB, C, HW)  images of the current block
    m_ref,              # (4, HW) f32 halo masks: [left, right, up, down]
    dw1_ref, b1a_ref,   # (C, 9) BN-folded depthwise-1 taps, (C, 1) folded bias
    pw1_ref, b1b_ref,   # (C, C) (out,in) pointwise-1 weights, (C, 1) bias
    dw2_ref, b2a_ref,   # (C, 9), (C, 1)
    pw2_ref, b2b_ref,   # (C, C), (C, 1)
    cw_ref, cb_ref,     # (NC, C) final 1x1 conv weights, (NC, 1) bias
    out_ref,            # (NB, NC, HW)
    *, W,
):
    NB, C, HW = x_ref.shape

    # Hoist the (1, HW) halo masks and pre-broadcast them to (C, HW) ONCE so
    # every later use is a plain VPU multiply (JAX does not CSE broadcasts).
    m = m_ref[...]
    ml = jnp.broadcast_to(m[0:1, :], (C, HW))   # a column to the left exists
    mr = jnp.broadcast_to(m[1:2, :], (C, HW))   # a column to the right exists
    mu = jnp.broadcast_to(m[2:3, :], (C, HW))   # a row above exists
    md = jnp.broadcast_to(m[3:4, :], (C, HW))   # a row below exists

    dw1, b1a = dw1_ref[...], b1a_ref[...]
    pw1, b1b = pw1_ref[...], b1b_ref[...]
    dw2, b2a = dw2_ref[...], b2a_ref[...]
    pw2, b2b = pw2_ref[...], b2b_ref[...]
    cw, cb = cw_ref[...], cb_ref[...]

    def depthwise3x3(a, dw, bias):
        # Row/column-factorized 3x3 depthwise conv on one (C, HW) image slab.
        # dw tap k = 3*(dy+1) + (dx+1).  4 XLU rolls + 4 masked slabs total.
        cl = ml * pltpu.roll(a, shift=1, axis=1)        # a[h, w-1]
        cr = mr * pltpu.roll(a, shift=HW - 1, axis=1)   # a[h, w+1]
        g_m1 = dw[:, 0:1] * cl + dw[:, 1:2] * a + dw[:, 2:3] * cr   # tap row dy=-1
        g_0 = dw[:, 3:4] * cl + dw[:, 4:5] * a + dw[:, 5:6] * cr    # tap row dy= 0
        g_p1 = dw[:, 6:7] * cl + dw[:, 7:8] * a + dw[:, 8:9] * cr   # tap row dy=+1
        acc = g_0 + bias
        # Column masks baked into cl/cr survive whole-row shifts, so only the
        # row masks are applied here (also kills wrap-around at image edges).
        acc = acc + mu * pltpu.roll(g_m1, shift=W, axis=1)        # row h-1
        acc = acc + md * pltpu.roll(g_p1, shift=HW - W, axis=1)   # row h+1
        return jnp.maximum(acc, 0.0)                              # folded BN + ReLU

    def pointwise(a, w, bias):
        # 1x1 conv on the MXU: (Cout, Cin) @ (Cin, HW); weight dtype (bf16 by
        # default) decides the MXU input dtype, accumulation is f32.
        z = jnp.dot(w, a.astype(w.dtype), preferred_element_type=jnp.float32)
        return jnp.maximum(z + bias, 0.0)

    for n in range(NB):          # small static loop over images in this block
        x = x_ref[n].astype(jnp.float32)
        z1 = pointwise(depthwise3x3(x, dw1, b1a), pw1, b1b)
        z2 = pointwise(depthwise3x3(z1, dw2, b2a), pw2, b2b)
        # Dropout(p=0.1) is identity at inference.
        o = jnp.dot(cw, z2.astype(cw.dtype),
                    preferred_element_type=jnp.float32) + cb
        out_ref[n] = o.astype(out_ref.dtype)


def _fold_params_for_kernel(p, matmul_dtype):
    """Fold eval-mode BN scales into conv weights; transpose to (out, in)."""
    q = {}
    q["dw1"] = jnp.transpose(p["dw1_w"] * p["s1a"])                     # (C, 9)
    q["b1a"] = p["b1a"].reshape(-1, 1)                                  # (C, 1)
    q["pw1"] = jnp.transpose(p["pw1_w"] * p["s1b"]).astype(matmul_dtype)
    q["b1b"] = p["b1b"].reshape(-1, 1)
    q["dw2"] = jnp.transpose(p["dw2_w"] * p["s2a"])
    q["b2a"] = p["b2a"].reshape(-1, 1)
    q["pw2"] = jnp.transpose(p["pw2_w"] * p["s2b"]).astype(matmul_dtype)
    q["b2b"] = p["b2b"].reshape(-1, 1)
    q["cw"] = jnp.transpose(p["conv_w"]).astype(matmul_dtype)           # (NC, C)
    q["cb"] = p["conv_b"].reshape(-1, 1)                                # (NC, 1)
    return q


def _default_images_per_block(N, C, HW, itemsize=4):
    # Keep >= 2 grid steps whenever possible so BlockSpec double-buffering can
    # prefetch block i+1 while block i computes; target ~<=1 MiB of input per
    # step and cap the in-kernel static unroll at 8 images.
    if N <= 1:
        return 1
    per_image = max(1, C * HW * itemsize)
    nb = max(1, min(N // 2, 8, (1 << 20) // per_image))
    while N % nb:
        nb -= 1
    return max(nb, 1)


def classifer_forward(x_nchw, params, images_per_block=None,
                      matmul_dtype=jnp.bfloat16):
    """x_nchw: (N, C, H, W) float32. Returns (N, num_classes, H, W)."""
    N, C, H, W = x_nchw.shape
    NC = params["conv_w"].shape[1]
    HW = H * W

    NB = (images_per_block if images_per_block is not None
          else _default_images_per_block(N, C, HW))
    assert N % NB == 0
    num_blocks = N // NB

    kp = _fold_params_for_kernel(params, matmul_dtype)

    # Free reshape (no HBM relayout): (N, C, H, W) -> (N, C, H*W).  Channels
    # stay on sublanes, each image is a contiguous lane-dense H*W slab, and
    # the output reshape back to NCHW below is equally free.
    x3 = x_nchw.reshape(N, C, HW)

    # Per-pixel 3x3-halo validity masks, computed once on the host (avoids
    # in-kernel vector integer // and %, which have no hardware path).
    hh = jnp.arange(H, dtype=jnp.int32).reshape(H, 1)
    ww = jnp.arange(W, dtype=jnp.int32).reshape(1, W)
    masks = jnp.stack([
        jnp.broadcast_to(ww >= 1, (H, W)),        # left neighbour exists
        jnp.broadcast_to(ww <= W - 2, (H, W)),    # right neighbour exists
        jnp.broadcast_to(hh >= 1, (H, W)),        # row above exists
        jnp.broadcast_to(hh <= H - 2, (H, W)),    # row below exists
    ]).reshape(4, HW).astype(jnp.float32)

    kernel = functools.partial(_classifer_kernel, W=W)
    full = lambda a: pl.BlockSpec(a.shape, lambda i: tuple(0 for _ in a.shape))

    # Rough live-VMEM estimate (double-buffered in/out blocks + f32 temps) so
    # the scoped VMEM limit is explicit: above v5e's 16 MiB default, safely
    # below v7x's 64 MiB physical VMEM.
    est = 4 * HW * (2 * NB * C + 2 * NB * NC + 4 + 18 * C) + (1 << 20)
    vmem_limit = int(min(max(2 * est, 16 << 20), 48 << 20))

    out = pl.pallas_call(
        kernel,
        out_shape=jax.ShapeDtypeStruct((N, NC, HW), jnp.float32),
        grid=(num_blocks,),
        in_specs=[
            pl.BlockSpec((NB, C, HW), lambda i: (i, 0, 0)),
            full(masks),
            full(kp["dw1"]), full(kp["b1a"]), full(kp["pw1"]), full(kp["b1b"]),
            full(kp["dw2"]), full(kp["b2a"]), full(kp["pw2"]), full(kp["b2b"]),
            full(kp["cw"]), full(kp["cb"]),
        ],
        out_specs=pl.BlockSpec((NB, NC, HW), lambda i: (i, 0, 0)),
        compiler_params=pltpu.CompilerParams(
            dimension_semantics=("parallel",),
            vmem_limit_bytes=vmem_limit),
    )(
        x3, masks,
        kp["dw1"], kp["b1a"], kp["pw1"], kp["b1b"],
        kp["dw2"], kp["b2a"], kp["pw2"], kp["b2b"],
        kp["cw"], kp["cb"],
    )

    return out.reshape(N, NC, H, W)


# ----------------------------- parameter setup -------------------------------
def make_params(key, C, NC):
    ks = jax.random.split(key, 16)
    eps = 1e-5

    def bn_fold(kg, kb, km, kv, ch):
        gamma = 1.0 + 0.1 * jax.random.normal(kg, (ch,), jnp.float32)
        beta = 0.1 * jax.random.normal(kb, (ch,), jnp.float32)
        mean = 0.1 * jax.random.normal(km, (ch,), jnp.float32)
        var = jnp.abs(jax.random.normal(kv, (ch,), jnp.float32)) + 0.5
        scale = gamma / jnp.sqrt(var + eps)
        bias = beta - mean * scale
        return scale.reshape(1, ch), bias.reshape(1, ch)

    p = {}
    # DSConv1
    p["dw1_w"] = 0.2 * jax.random.normal(ks[0], (9, C), jnp.float32)
    p["s1a"], p["b1a"] = bn_fold(ks[1], ks[2], ks[3], ks[3], C)
    p["pw1_w"] = 0.2 * jax.random.normal(ks[4], (C, C), jnp.float32)
    p["s1b"], p["b1b"] = bn_fold(ks[5], ks[6], ks[7], ks[7], C)
    # DSConv2
    p["dw2_w"] = 0.2 * jax.random.normal(ks[8], (9, C), jnp.float32)
    p["s2a"], p["b2a"] = bn_fold(ks[9], ks[10], ks[11], ks[11], C)
    p["pw2_w"] = 0.2 * jax.random.normal(ks[12], (C, C), jnp.float32)
    p["s2b"], p["b2b"] = bn_fold(ks[13], ks[14], ks[15], ks[15], C)
    # final 1x1 conv (with bias)
    p["conv_w"] = 0.2 * jax.random.normal(ks[0], (C, NC), jnp.float32)
    p["conv_b"] = 0.1 * jax.random.normal(ks[1], (1, NC), jnp.float32)
    return p


# ------------------------- pure-JAX reference (for check) --------------------
def reference_forward(x_nchw, params):
    C = x_nchw.shape[1]
    x = jnp.transpose(x_nchw, (0, 2, 3, 1))  # NHWC

    def dw_conv(xh, w9c):
        k = w9c.reshape(3, 3, 1, C)
        return jax.lax.conv_general_dilated(
            xh, k, (1, 1), "SAME",
            dimension_numbers=("NHWC", "HWIO", "NHWC"),
            feature_group_count=C)

    def dsconv(xh, dw, sa, ba, pw, sb, bb):
        y = jnp.maximum(dw_conv(xh, dw) * sa.reshape(1, 1, 1, -1)
                        + ba.reshape(1, 1, 1, -1), 0.0)
        z = jnp.einsum("nhwc,cd->nhwd", y, pw)
        return jnp.maximum(z * sb.reshape(1, 1, 1, -1)
                           + bb.reshape(1, 1, 1, -1), 0.0)

    x = dsconv(x, params["dw1_w"], params["s1a"], params["b1a"],
               params["pw1_w"], params["s1b"], params["b1b"])
    x = dsconv(x, params["dw2_w"], params["s2a"], params["b2a"],
               params["pw2_w"], params["s2b"], params["b2b"])
    o = jnp.einsum("nhwc,cd->nhwd", x, params["conv_w"]) \
        + params["conv_b"].reshape(1, 1, 1, -1)
    return jnp.transpose(o, (0, 3, 1, 2))


if __name__ == "__main__":
    N, C, H, W = 2, 8, 16, 16        # dw_channels = 8
    NC = 5                           # num_classes = 5

    key = jax.random.PRNGKey(0)
    kx, kp = jax.random.split(key)
    x = jax.random.normal(kx, (N, C, H, W), jnp.float32)   # PyTorch NCHW input
    params = make_params(kp, C, NC)

    ref = jax.block_until_ready(reference_forward(x, params))

    # Exact (f32-MXU) path: tight check against the f32 reference.
    out_f32 = jax.block_until_ready(
        classifer_forward(x, params, matmul_dtype=jnp.float32))
    assert out_f32.shape == (N, NC, H, W), out_f32.shape
    assert jnp.allclose(out_f32, ref, rtol=1e-4, atol=1e-4), float(
        jnp.max(jnp.abs(out_f32 - ref)))

    # Default performance path (bf16 MXU inputs, f32 accumulation): looser
    # tolerance purely due to bf16 weight/activation quantization.
    out = jax.block_until_ready(classifer_forward(x, params))
    assert out.shape == (N, NC, H, W), out.shape
    assert jnp.allclose(out, ref, rtol=1e-1, atol=1e-1), float(
        jnp.max(jnp.abs(out - ref)))

    print("KERNEL_OK")
</pallas_src>

<mosaic_0001>
module attributes {stable_mosaic.version = 11 : i64} {
  func.func @_classifer_kernel(%arg0: i32, %arg1: memref<1x8x256xf32, #tpu.memory_space<vmem>>, %arg2: memref<4x256xf32, #tpu.memory_space<vmem>>, %arg3: memref<8x9xf32, #tpu.memory_space<vmem>>, %arg4: memref<8x1xf32, #tpu.memory_space<vmem>>, %arg5: memref<8x8xf32, #tpu.memory_space<vmem>>, %arg6: memref<8x1xf32, #tpu.memory_space<vmem>>, %arg7: memref<8x9xf32, #tpu.memory_space<vmem>>, %arg8: memref<8x1xf32, #tpu.memory_space<vmem>>, %arg9: memref<8x8xf32, #tpu.memory_space<vmem>>, %arg10: memref<8x1xf32, #tpu.memory_space<vmem>>, %arg11: memref<5x8xf32, #tpu.memory_space<vmem>>, %arg12: memref<5x1xf32, #tpu.memory_space<vmem>>, %arg13: memref<1x5x256xf32, #tpu.memory_space<vmem>>) attributes {dimension_semantics = [#tpu.dimension_semantics<parallel>], iteration_bounds = array<i64: 2>, scalar_prefetch = 0 : i64, scratch_operands = 0 : i64, tpu.core_type = #tpu.core_type<tc>, window_params = [{transform_indices = @transform_0, window_bounds = array<i64: 1, 8, 256>}, {pipeline_mode = #tpu.pipeline_mode<synchronous>, transform_indices = @transform_1, window_bounds = array<i64: 4, 256>}, {pipeline_mode = #tpu.pipeline_mode<synchronous>, transform_indices = @transform_2, window_bounds = array<i64: 8, 9>}, {pipeline_mode = #tpu.pipeline_mode<synchronous>, transform_indices = @transform_3, window_bounds = array<i64: 8, 1>}, {pipeline_mode = #tpu.pipeline_mode<synchronous>, transform_indices = @transform_4, window_bounds = array<i64: 8, 8>}, {pipeline_mode = #tpu.pipeline_mode<synchronous>, transform_indices = @transform_5, window_bounds = array<i64: 8, 1>}, {pipeline_mode = #tpu.pipeline_mode<synchronous>, transform_indices = @transform_6, window_bounds = array<i64: 8, 9>}, {pipeline_mode = #tpu.pipeline_mode<synchronous>, transform_indices = @transform_7, window_bounds = array<i64: 8, 1>}, {pipeline_mode = #tpu.pipeline_mode<synchronous>, transform_indices = @transform_8, window_bounds = array<i64: 8, 8>}, {pipeline_mode = #tpu.pipeline_mode<synchronous>, transform_indices = @transform_9, window_bounds = array<i64: 8, 1>}, {pipeline_mode = #tpu.pipeline_mode<synchronous>, transform_indices = @transform_10, window_bounds = array<i64: 5, 8>}, {pipeline_mode = #tpu.pipeline_mode<synchronous>, transform_indices = @transform_11, window_bounds = array<i64: 5, 1>}, {transform_indices = @transform_12, window_bounds = array<i64: 1, 5, 256>}]} {
    %c0 = arith.constant 0 : index
    %c0_0 = arith.constant 0 : index
    %0 = vector.load %arg2[%c0, %c0_0] : memref<4x256xf32, #tpu.memory_space<vmem>>, vector<4x256xf32>
    %1 = vector.extract_strided_slice %0 {offsets = [0, 0], sizes = [1, 256], strides = [1, 1]} : vector<4x256xf32> to vector<1x256xf32>
    %2 = vector.shape_cast %1 : vector<1x256xf32> to vector<1x256xf32>
    %3 = vector.broadcast %2 : vector<1x256xf32> to vector<8x256xf32>
    %4 = vector.extract_strided_slice %0 {offsets = [1, 0], sizes = [1, 256], strides = [1, 1]} : vector<4x256xf32> to vector<1x256xf32>
    %5 = vector.shape_cast %4 : vector<1x256xf32> to vector<1x256xf32>
    %6 = vector.broadcast %5 : vector<1x256xf32> to vector<8x256xf32>
    %7 = vector.extract_strided_slice %0 {offsets = [2, 0], sizes = [1, 256], strides = [1, 1]} : vector<4x256xf32> to vector<1x256xf32>
    %8 = vector.shape_cast %7 : vector<1x256xf32> to vector<1x256xf32>
    %9 = vector.broadcast %8 : vector<1x256xf32> to vector<8x256xf32>
    %10 = vector.extract_strided_slice %0 {offsets = [3, 0], sizes = [1, 256], strides = [1, 1]} : vector<4x256xf32> to vector<1x256xf32>
    %11 = vector.shape_cast %10 : vector<1x256xf32> to vector<1x256xf32>
    %12 = vector.broadcast %11 : vector<1x256xf32> to vector<8x256xf32>
    %c0_1 = arith.constant 0 : index
    %c0_2 = arith.constant 0 : index
    %13 = vector.load %arg3[%c0_1, %c0_2] : memref<8x9xf32, #tpu.memory_space<vmem>>, vector<8x9xf32>
    %c0_3 = arith.constant 0 : index
    %c0_4 = arith.constant 0 : index
    %14 = vector.load %arg4[%c0_3, %c0_4] : memref<8x1xf32, #tpu.memory_space<vmem>>, vector<8x1xf32>
    %c0_5 = arith.constant 0 : index
    %c0_6 = arith.constant 0 : index
    %15 = vector.load %arg5[%c0_5, %c0_6] : memref<8x8xf32, #tpu.memory_space<vmem>>, vector<8x8xf32>
    %c0_7 = arith.constant 0 : index
    %c0_8 = arith.constant 0 : index
    %16 = vector.load %arg6[%c0_7, %c0_8] : memref<8x1xf32, #tpu.memory_space<vmem>>, vector<8x1xf32>
    %c0_9 = arith.constant 0 : index
    %c0_10 = arith.constant 0 : index
    %17 = vector.load %arg7[%c0_9, %c0_10] : memref<8x9xf32, #tpu.memory_space<vmem>>, vector<8x9xf32>
    %c0_11 = arith.constant 0 : index
    %c0_12 = arith.constant 0 : index
    %18 = vector.load %arg8[%c0_11, %c0_12] : memref<8x1xf32, #tpu.memory_space<vmem>>, vector<8x1xf32>
    %c0_13 = arith.constant 0 : index
    %c0_14 = arith.constant 0 : index
    %19 = vector.load %arg9[%c0_13, %c0_14] : memref<8x8xf32, #tpu.memory_space<vmem>>, vector<8x8xf32>
    %c0_15 = arith.constant 0 : index
    %c0_16 = arith.constant 0 : index
    %20 = vector.load %arg10[%c0_15, %c0_16] : memref<8x1xf32, #tpu.memory_space<vmem>>, vector<8x1xf32>
    %c0_17 = arith.constant 0 : index
    %c0_18 = arith.constant 0 : index
    %21 = vector.load %arg11[%c0_17, %c0_18] : memref<5x8xf32, #tpu.memory_space<vmem>>, vector<5x8xf32>
    %c0_19 = arith.constant 0 : index
    %c0_20 = arith.constant 0 : index
    %22 = vector.load %arg12[%c0_19, %c0_20] : memref<5x1xf32, #tpu.memory_space<vmem>>, vector<5x1xf32>
    %c0_21 = arith.constant 0 : index
    %c0_22 = arith.constant 0 : index
    %c0_23 = arith.constant 0 : index
    %23 = vector.load %arg1[%c0_21, %c0_22, %c0_23] : memref<1x8x256xf32, #tpu.memory_space<vmem>>, vector<1x8x256xf32>
    %24 = vector.shape_cast %23 : vector<1x8x256xf32> to vector<8x256xf32>
    %c1_i32 = arith.constant 1 : i32
    %25 = tpu.dynamic_rotate %24 by %c1_i32 dim 1 : vector<8x256xf32>, i32 -> vector<8x256xf32>
    %26 = arith.mulf %3, %25 : vector<8x256xf32>
    %c255_i32 = arith.constant 255 : i32
    %27 = tpu.dynamic_rotate %24 by %c255_i32 dim 1 : vector<8x256xf32>, i32 -> vector<8x256xf32>
    %28 = arith.mulf %6, %27 : vector<8x256xf32>
    %29 = vector.extract_strided_slice %13 {offsets = [0, 0], sizes = [8, 1], strides = [1, 1]} : vector<8x9xf32> to vector<8x1xf32>
    %30 = vector.broadcast %29 : vector<8x1xf32> to vector<8x256xf32>
    %31 = arith.mulf %30, %26 : vector<8x256xf32>
    %32 = vector.extract_strided_slice %13 {offsets = [0, 1], sizes = [8, 1], strides = [1, 1]} : vector<8x9xf32> to vector<8x1xf32>
    %33 = vector.broadcast %32 : vector<8x1xf32> to vector<8x256xf32>
    %34 = arith.mulf %33, %24 : vector<8x256xf32>
    %35 = arith.addf %31, %34 : vector<8x256xf32>
    %36 = vector.extract_strided_slice %13 {offsets = [0, 2], sizes = [8, 1], strides = [1, 1]} : vector<8x9xf32> to vector<8x1xf32>
    %37 = vector.broadcast %36 : vector<8x1xf32> to vector<8x256xf32>
    %38 = arith.mulf %37, %28 : vector<8x256xf32>
    %39 = arith.addf %35, %38 : vector<8x256xf32>
    %40 = vector.extract_strided_slice %13 {offsets = [0, 3], sizes = [8, 1], strides = [1, 1]} : vector<8x9xf32> to vector<8x1xf32>
    %41 = vector.broadcast %40 : vector<8x1xf32> to vector<8x256xf32>
    %42 = arith.mulf %41, %26 : vector<8x256xf32>
    %43 = vector.extract_strided_slice %13 {offsets = [0, 4], sizes = [8, 1], strides = [1, 1]} : vector<8x9xf32> to vector<8x1xf32>
    %44 = vector.broadcast %43 : vector<8x1xf32> to vector<8x256xf32>
    %45 = arith.mulf %44, %24 : vector<8x256xf32>
    %46 = arith.addf %42, %45 : vector<8x256xf32>
    %47 = vector.extract_strided_slice %13 {offsets = [0, 5], sizes = [8, 1], strides = [1, 1]} : vector<8x9xf32> to vector<8x1xf32>
    %48 = vector.broadcast %47 : vector<8x1xf32> to vector<8x256xf32>
    %49 = arith.mulf %48, %28 : vector<8x256xf32>
    %50 = arith.addf %46, %49 : vector<8x256xf32>
    %51 = vector.extract_strided_slice %13 {offsets = [0, 6], sizes = [8, 1], strides = [1, 1]} : vector<8x9xf32> to vector<8x1xf32>
    %52 = vector.broadcast %51 : vector<8x1xf32> to vector<8x256xf32>
    %53 = arith.mulf %52, %26 : vector<8x256xf32>
    %54 = vector.extract_strided_slice %13 {offsets = [0, 7], sizes = [8, 1], strides = [1, 1]} : vector<8x9xf32> to vector<8x1xf32>
    %55 = vector.broadcast %54 : vector<8x1xf32> to vector<8x256xf32>
    %56 = arith.mulf %55, %24 : vector<8x256xf32>
    %57 = arith.addf %53, %56 : vector<8x256xf32>
    %58 = vector.extract_strided_slice %13 {offsets = [0, 8], sizes = [8, 1], strides = [1, 1]} : vector<8x9xf32> to vector<8x1xf32>
    %59 = vector.broadcast %58 : vector<8x1xf32> to vector<8x256xf32>
    %60 = arith.mulf %59, %28 : vector<8x256xf32>
    %61 = arith.addf %57, %60 : vector<8x256xf32>
    %62 = vector.broadcast %14 : vector<8x1xf32> to vector<8x256xf32>
    %63 = arith.addf %50, %62 : vector<8x256xf32>
    %c16_i32 = arith.constant 16 : i32
    %64 = tpu.dynamic_rotate %39 by %c16_i32 dim 1 : vector<8x256xf32>, i32 -> vector<8x256xf32>
    %65 = arith.mulf %9, %64 : vector<8x256xf32>
    %66 = arith.addf %63, %65 : vector<8x256xf32>
    %c240_i32 = arith.constant 240 : i32
    %67 = tpu.dynamic_rotate %61 by %c240_i32 dim 1 : vector<8x256xf32>, i32 -> vector<8x256xf32>
    %68 = arith.mulf %12, %67 : vector<8x256xf32>
    %69 = arith.addf %66, %68 : vector<8x256xf32>
    %cst = arith.constant 0.000000e+00 : f32
    %70 = vector.broadcast %cst : f32 to vector<8x256xf32>
    %71 = arith.maximumf %69, %70 : vector<8x256xf32>
    %cst_24 = arith.constant dense<0.000000e+00> : vector<8x256xf32>
    %72 = tpu.matmul %15, %71, %cst_24 {dimension_numbers = #tpu.dot_dimension_numbers<[1], [0], [0], [1], [0, 0, 1, 1], [], []>} : vector<8x8xf32>, vector<8x256xf32>, vector<8x256xf32> -> vector<8x256xf32>
    %73 = vector.broadcast %16 : vector<8x1xf32> to vector<8x256xf32>
    %74 = arith.addf %72, %73 : vector<8x256xf32>
    %cst_25 = arith.constant 0.000000e+00 : f32
    %75 = vector.broadcast %cst_25 : f32 to vector<8x256xf32>
    %76 = arith.maximumf %74, %75 : vector<8x256xf32>
    %c1_i32_26 = arith.constant 1 : i32
    %77 = tpu.dynamic_rotate %76 by %c1_i32_26 dim 1 : vector<8x256xf32>, i32 -> vector<8x256xf32>
    %78 = arith.mulf %3, %77 : vector<8x256xf32>
    %c255_i32_27 = arith.constant 255 : i32
    %79 = tpu.dynamic_rotate %76 by %c255_i32_27 dim 1 : vector<8x256xf32>, i32 -> vector<8x256xf32>
    %80 = arith.mulf %6, %79 : vector<8x256xf32>
    %81 = vector.extract_strided_slice %17 {offsets = [0, 0], sizes = [8, 1], strides = [1, 1]} : vector<8x9xf32> to vector<8x1xf32>
    %82 = vector.broadcast %81 : vector<8x1xf32> to vector<8x256xf32>
    %83 = arith.mulf %82, %78 : vector<8x256xf32>
    %84 = vector.extract_strided_slice %17 {offsets = [0, 1], sizes = [8, 1], strides = [1, 1]} : vector<8x9xf32> to vector<8x1xf32>
    %85 = vector.broadcast %84 : vector<8x1xf32> to vector<8x256xf32>
    %86 = arith.mulf %85, %76 : vector<8x256xf32>
    %87 = arith.addf %83, %86 : vector<8x256xf32>
    %88 = vector.extract_strided_slice %17 {offsets = [0, 2], sizes = [8, 1], strides = [1, 1]} : vector<8x9xf32> to vector<8x1xf32>
    %89 = vector.broadcast %88 : vector<8x1xf32> to vector<8x256xf32>
    %90 = arith.mulf %89, %80 : vector<8x256xf32>
    %91 = arith.addf %87, %90 : vector<8x256xf32>
    %92 = vector.extract_strided_slice %17 {offsets = [0, 3], sizes = [8, 1], strides = [1, 1]} : vector<8x9xf32> to vector<8x1xf32>
    %93 = vector.broadcast %92 : vector<8x1xf32> to vector<8x256xf32>
    %94 = arith.mulf %93, %78 : vector<8x256xf32>
    %95 = vector.extract_strided_slice %17 {offsets = [0, 4], sizes = [8, 1], strides = [1, 1]} : vector<8x9xf32> to vector<8x1xf32>
    %96 = vector.broadcast %95 : vector<8x1xf32> to vector<8x256xf32>
    %97 = arith.mulf %96, %76 : vector<8x256xf32>
    %98 = arith.addf %94, %97 : vector<8x256xf32>
    %99 = vector.extract_strided_slice %17 {offsets = [0, 5], sizes = [8, 1], strides = [1, 1]} : vector<8x9xf32> to vector<8x1xf32>
    %100 = vector.broadcast %99 : vector<8x1xf32> to vector<8x256xf32>
    %101 = arith.mulf %100, %80 : vector<8x256xf32>
    %102 = arith.addf %98, %101 : vector<8x256xf32>
    %103 = vector.extract_strided_slice %17 {offsets = [0, 6], sizes = [8, 1], strides = [1, 1]} : vector<8x9xf32> to vector<8x1xf32>
    %104 = vector.broadcast %103 : vector<8x1xf32> to vector<8x256xf32>
    %105 = arith.mulf %104, %78 : vector<8x256xf32>
    %106 = vector.extract_strided_slice %17 {offsets = [0, 7], sizes = [8, 1], strides = [1, 1]} : vector<8x9xf32> to vector<8x1xf32>
    %107 = vector.broadcast %106 : vector<8x1xf32> to vector<8x256xf32>
    %108 = arith.mulf %107, %76 : vector<8x256xf32>
    %109 = arith.addf %105, %108 : vector<8x256xf32>
    %110 = vector.extract_strided_slice %17 {offsets = [0, 8], sizes = [8, 1], strides = [1, 1]} : vector<8x9xf32> to vector<8x1xf32>
    %111 = vector.broadcast %110 : vector<8x1xf32> to vector<8x256xf32>
    %112 = arith.mulf %111, %80 : vector<8x256xf32>
    %113 = arith.addf %109, %112 : vector<8x256xf32>
    %114 = vector.broadcast %18 : vector<8x1xf32> to vector<8x256xf32>
    %115 = arith.addf %102, %114 : vector<8x256xf32>
    %c16_i32_28 = arith.constant 16 : i32
    %116 = tpu.dynamic_rotate %91 by %c16_i32_28 dim 1 : vector<8x256xf32>, i32 -> vector<8x256xf32>
    %117 = arith.mulf %9, %116 : vector<8x256xf32>
    %118 = arith.addf %115, %117 : vector<8x256xf32>
    %c240_i32_29 = arith.constant 240 : i32
    %119 = tpu.dynamic_rotate %113 by %c240_i32_29 dim 1 : vector<8x256xf32>, i32 -> vector<8x256xf32>
    %120 = arith.mulf %12, %119 : vector<8x256xf32>
    %121 = arith.addf %118, %120 : vector<8x256xf32>
    %cst_30 = arith.constant 0.000000e+00 : f32
    %122 = vector.broadcast %cst_30 : f32 to vector<8x256xf32>
    %123 = arith.maximumf %121, %122 : vector<8x256xf32>
    %cst_31 = arith.constant dense<0.000000e+00> : vector<8x256xf32>
    %124 = tpu.matmul %19, %123, %cst_31 {dimension_numbers = #tpu.dot_dimension_numbers<[1], [0], [0], [1], [0, 0, 1, 1], [], []>} : vector<8x8xf32>, vector<8x256xf32>, vector<8x256xf32> -> vector<8x256xf32>
    %125 = vector.broadcast %20 : vector<8x1xf32> to vector<8x256xf32>
    %126 = arith.addf %124, %125 : vector<8x256xf32>
    %cst_32 = arith.constant 0.000000e+00 : f32
    %127 = vector.broadcast %cst_32 : f32 to vector<8x256xf32>
    %128 = arith.maximumf %126, %127 : vector<8x256xf32>
    %cst_33 = arith.constant dense<0.000000e+00> : vector<5x256xf32>
    %129 = tpu.matmul %21, %128, %cst_33 {dimension_numbers = #tpu.dot_dimension_numbers<[1], [0], [0], [1], [0, 0, 1, 1], [], []>} : vector<5x8xf32>, vector<8x256xf32>, vector<5x256xf32> -> vector<5x256xf32>
    %130 = vector.broadcast %22 : vector<5x1xf32> to vector<5x256xf32>
    %131 = arith.addf %129, %130 : vector<5x256xf32>
    %c0_34 = arith.constant 0 : index
    %c0_35 = arith.constant 0 : index
    %c0_36 = arith.constant 0 : index
    %132 = vector.load %arg13[%c0_34, %c0_35, %c0_36] : memref<1x5x256xf32, #tpu.memory_space<vmem>>, vector<1x5x256xf32>
    %133 = vector.shape_cast %132 : vector<1x5x256xf32> to vector<5x256xf32>
    %134 = vector.shape_cast %131 : vector<5x256xf32> to vector<1x5x256xf32>
    tpu.vector_store %arg13[%c0_34, %c0_35, %c0_36], %134 {strides = array<i32>} : memref<1x5x256xf32, #tpu.memory_space<vmem>>, vector<1x5x256xf32>,
    return
  }
  func.func @transform_0(%arg0: i32) -> (i32, i32, i32) {
    %c0_i32 = arith.constant 0 : i32
    %c0_i32_0 = arith.constant 0 : i32
    %c0_i32_1 = arith.constant 0 : i32
    return %arg0, %c0_i32, %c0_i32_0 : i32, i32, i32
  }
  func.func @transform_1(%arg0: i32) -> (i32, i32) {
    %c0_i32 = arith.constant 0 : i32
    %c0_i32_0 = arith.constant 0 : i32
    %c0_i32_1 = arith.constant 0 : i32
    return %c0_i32, %c0_i32_0 : i32, i32
  }
  func.func @transform_2(%arg0: i32) -> (i32, i32) {
    %c0_i32 = arith.constant 0 : i32
    %c0_i32_0 = arith.constant 0 : i32
    %c0_i32_1 = arith.constant 0 : i32
    return %c0_i32, %c0_i32_0 : i32, i32
  }
  func.func @transform_3(%arg0: i32) -> (i32, i32) {
    %c0_i32 = arith.constant 0 : i32
    %c0_i32_0 = arith.constant 0 : i32
    %c0_i32_1 = arith.constant 0 : i32
    return %c0_i32, %c0_i32_0 : i32, i32
  }
  func.func @transform_4(%arg0: i32) -> (i32, i32) {
    %c0_i32 = arith.constant 0 : i32
    %c0_i32_0 = arith.constant 0 : i32
    %c0_i32_1 = arith.constant 0 : i32
    return %c0_i32, %c0_i32_0 : i32, i32
  }
  func.func @transform_5(%arg0: i32) -> (i32, i32) {
    %c0_i32 = arith.constant 0 : i32
    %c0_i32_0 = arith.constant 0 : i32
    %c0_i32_1 = arith.constant 0 : i32
    return %c0_i32, %c0_i32_0 : i32, i32
  }
  func.func @transform_6(%arg0: i32) -> (i32, i32) {
    %c0_i32 = arith.constant 0 : i32
    %c0_i32_0 = arith.constant 0 : i32
    %c0_i32_1 = arith.constant 0 : i32
    return %c0_i32, %c0_i32_0 : i32, i32
  }
  func.func @transform_7(%arg0: i32) -> (i32, i32) {
    %c0_i32 = arith.constant 0 : i32
    %c0_i32_0 = arith.constant 0 : i32
    %c0_i32_1 = arith.constant 0 : i32
    return %c0_i32, %c0_i32_0 : i32, i32
  }
  func.func @transform_8(%arg0: i32) -> (i32, i32) {
    %c0_i32 = arith.constant 0 : i32
    %c0_i32_0 = arith.constant 0 : i32
    %c0_i32_1 = arith.constant 0 : i32
    return %c0_i32, %c0_i32_0 : i32, i32
  }
  func.func @transform_9(%arg0: i32) -> (i32, i32) {
    %c0_i32 = arith.constant 0 : i32
    %c0_i32_0 = arith.constant 0 : i32
    %c0_i32_1 = arith.constant 0 : i32
    return %c0_i32, %c0_i32_0 : i32, i32
  }
  func.func @transform_10(%arg0: i32) -> (i32, i32) {
    %c0_i32 = arith.constant 0 : i32
    %c0_i32_0 = arith.constant 0 : i32
    %c0_i32_1 = arith.constant 0 : i32
    return %c0_i32, %c0_i32_0 : i32, i32
  }
  func.func @transform_11(%arg0: i32) -> (i32, i32) {
    %c0_i32 = arith.constant 0 : i32
    %c0_i32_0 = arith.constant 0 : i32
    %c0_i32_1 = arith.constant 0 : i32
    return %c0_i32, %c0_i32_0 : i32, i32
  }
  func.func @transform_12(%arg0: i32) -> (i32, i32, i32) {
    %c0_i32 = arith.constant 0 : i32
    %c0_i32_0 = arith.constant 0 : i32
    %c0_i32_1 = arith.constant 0 : i32
    return %arg0, %c0_i32, %c0_i32_0 : i32, i32, i32
  }
}

</mosaic_0001>

<bundles_post_ra>
// kernel: tpu_custom_call.1
= control target key start
LH: loop header
LB: loop body
LE: loop exit
PB: predicated region body
PF: predicated region fallthrough
CT: control target
= control target key end

     0   :  { %17 = vsyncpa [#allocation3], 0  ;;  %s1433_s0 = inlined_call_operand.hbm [shape: f32[2,8,256], index: 0, kind: input, shape index: {}]   ;;  %s1434_s1 = inlined_call_operand.vmem [shape: f32[4,256], index: 1, kind: input, shape index: {}]   ;;  %s1435_s2 = inlined_call_operand.vmem [shape: f32[8,9], index: 2, kind: input, shape index: {}]   ;;  %s1436_s3 = inlined_call_operand.vmem [shape: f32[8,1], index: 3, kind: input, shape index: {}]   ;;  %s1437_s4 = inlined_call_operand.vmem [shape: f32[8,8], index: 4, kind: input, shape index: {}]   ;;  %s1438_s5 = inlined_call_operand.vmem [shape: f32[8,1], index: 5, kind: input, shape index: {}]   ;;  %s1439_s6 = inlined_call_operand.vmem [shape: f32[8,9], index: 6, kind: input, shape index: {}]   ;;  %s1440_s7 = inlined_call_operand.vmem [shape: f32[8,1], index: 7, kind: input, shape index: {}]   ;;  %s1441_s8 = inlined_call_operand.vmem [shape: f32[8,8], index: 8, kind: input, shape index: {}]   ;;  %s1442_s9 = inlined_call_operand.vmem [shape: f32[8,1], index: 9, kind: input, shape index: {}]   ;;  %s1443_s10 = inlined_call_operand.vmem [shape: f32[5,8], index: 10, kind: input, shape index: {}]   ;;  %s1444_s11 = inlined_call_operand.vmem [shape: f32[5,1], index: 11, kind: input, shape index: {}]   ;;  %s1445_s12 = inlined_call_operand.vmem [shape: f32[2,5,256], index: 12, kind: output, shape index: {}]  }
   0x1   :  { %19 = vsyncpa [#allocation3 + $0x1], 0  ;;  %s1157_s21 = smov 0   ;;  %s1159_s22 = smov 0  }
   0x2   :  { %s1161_s23 = smov 0   ;;  %s1163_s24 = smov 0  }
   0x3 LB: > { %1449 = sst [smem:[#allocation5_spill]] %s1073_s23  ;;  %s1176_s25 = sadd.s32 4294967295, %s1077_s24   ;;  %s1077_s24 = sphi %s1163_s24, %s1455_s24   ;;  %s1073_s23 = sphi %s1161_s23, %s1457_s23   ;;  %s1069_s22 = sphi %s1159_s22, %s1459_s22   ;;  %s1065_s21 = sphi %s1157_s21, %s1458_s21  }
   0x4   : > { %s1179_s26 = sadd.s32 1, %s1077_s24   ;;  %s32_s28 = sadd.s32 1, %s1073_s23 }
   0x5   : > { %1450 = sst [smem:[#allocation6_spill]] %s1179_s26  ;;  %s29_s27 = ssub.s32 %s1077_s24, %s1179_s26 }
   0x6   : > { %p30_p0 = scmp.eq.s32.totalorder %s29_s27, 0  ;;  %p39_p1 = scmp.ne.s32.totalorder %s1073_s23, %s1069_s22 }
   0x7   : > { %p40_p2 = scmp.eq.s32.totalorder %s1077_s24, 0  ;;  %p45_p3 = scmp.ne.s32.totalorder %s1069_s22, %s1065_s21 }
   0x8   : > { %s1189_s29 = scalar_select %p30_p0, %s1073_s23, %s32_s28  }
   0x9   : > { %p1191_p4 = por %p40_p2, %p39_p1  ;;  %p46_p5 = scmp.eq.s32.totalorder %s1176_s25, 0 }
   0xa   : > { %1451 = sst [smem:[#allocation7_spill]] %s1189_s29  ;;  %p946_p6 = scmp.lt.s32.totalorder %s1077_s24, 2 }
   0xb   : > { %p1197_p7 = por %p46_p5, %p45_p3  ;;  %s359_s14 = sand.u32 1, %s1073_s23  }
   0xc   : > { %s923_s15 = sshll.u32 %s359_s14, 4  ;;  %s938_s16 = sshll.u32 %s1077_s24, 4 }
   0xd   : > { %s368_s19 = scalar_lea.hbm %s1433_s0, %s938_s16  ;;  %s363_s20 = scalar_lea.vmem [#allocation2], %s923_s15 }
   0xe   : > { %s372_s21 = sshll.u32 %s363_s20, 4  ;;  %s370_s27 = sshll.u32 %s368_s19, 4  ;;  %s373_s21 = int_to_ptr.vmem [resolvable:$true] %s372_s21  ;;  %s371_s27 = int_to_ptr.hbm [resolvable:$true] %s370_s27 }
   0xf   : > { %p1208_p8 = pnand %p946_p6, %p1191_p4  ;;  %p926_p9 = scmp.ge.s32.totalorder %s1077_s24, 1 }
  0x10   : > { %p377_p10 = scmp.lt.s32.totalorder %s1077_s24, 3  ;;  %s360_s29 = scalar_lea.sflag [#allocation3], %s359_s14 }
  0x11   : > { %s1013_s23 = sshra.s32 %s371_s27, 4  ;;  %p1017_p12 = pneg %p1208_p8  ;;  %s1014_s23 = int_to_ptr.hbm [resolvable:$true] %s1013_s23 }
  0x12   : > { %s1015_s26 = scalar_lea.hbm %s1014_s23, 16  ;;  %s1020_s30 = scalar_lea.hbm %s1433_s0, 32 }
  0x13   : > { %p1016_p11 = scmp.ne.s32.totalorder %s1014_s23, %s1015_s26  ;;  %p1021_p1 = scmp.lt.s32.totalorder %s1014_s23, %s1433_s0 }
  0x14   : > { %p1022_p2 = scmp.lt.s32.totalorder %s1020_s30, %s1015_s26 }
  0x15   : > { %p1018_p13 = pnand %p1017_p12, %p1016_p11 }
  0x16   : > { %p1023_p3 = por %p1022_p2, %p1021_p1 }
  0x17   : > { %p1019_p0 = pneg %p1018_p13 }
  0x19   : > { %p1024_p4 = pnand %p1023_p3, %p1019_p0 }
  0x1b   : > { %1027 = shalt.err (!%p1024_p4)
}
  0x1c   : > { %945 = dma.hbm_to_vmem [thread:$0]  (!%p1208_p8), %s371_s27, 256, %s373_s21, %s360_s29  }
  0x1d   : > { %p378_p5 = pnand %p926_p9, %p377_p10 }
  0x1e   : > { %s383_s14 = sand.u32 (!%p378_p5), 1, %s1069_s22  }
  0x1f   : > { %381 = sbr.rel (%p378_p5) target bundleno = 971 (0x3cb), region = 68  ;;  %s927_s19 = sshll.u32 (!%p378_p5), %s383_s14, 4 }
  0x20   : > { %s384_s20 = scalar_lea.sflag (!%p378_p5), [#allocation3], %s383_s14  ;;  %s387_s15 = scalar_lea.vmem (!%p378_p5), [#allocation2], %s927_s19 }
  0x24   : > { %1060 = dma.done.wait (%p1197_p7), %s384_s20, 256  }
  0x25   : > { %1062 = vsyncadd (%p1197_p7), %s384_s20, 4294967040  ;;  %v1079_v0 = vmov 0   ;;  %v1080_v1 = vmov 6   ;;  %v1081_v2 = vmov 2   ;;  %v1235_v3 = vld [vmem:[%s387_s15] sm:$0xff]  ;;  %s1082_s26 = smov 127   ;;  %v476_v12 = vlaneseq }
  0x26   : > { %992 = vset.pattern.permute.xlu2 %v1079_v0  ;;  %995 = vset.pattern.permute.xlu1 %v1080_v1  ;;  %v460_v4 = vld [vmem:[%s1435_s2] sm:$0xff]  ;;  %s1083_s29 = smov 1   ;;  %v1244_v5 = vld [vmem:[%s387_s15 + $0x8] sm:$0xff]  ;;  %v1084_v6 = vmov 1   ;;  %v1085_v7 = vmov 7   ;;  %v1086_v8 = vmov 8  }
  0x27   : > { %994 = vset.pattern.permute.xlu0 %v1081_v2  ;;  %483 = vrot.lane.b32.xlu1 %v1235_v3, %s1082_s26  ;;  %v1087_v9 = vmov 4   ;;  %v1088_v10 = vmov 3   ;;  %v1089_v11 = vmov 5   ;;  %v1261_v14 = vld [vmem:[%s1434_s1] sm:$0xff]  ;;  %v1263_v17 = vand.u32 127, %v476_v12  ;;  %s1090_s27 = smov 16  }
  0x28   : > { %472 = vrot.lane.b32.xlu0 %v1235_v3, %s1083_s29  ;;  %494 = vperm.xlu2 %992, %v460_v4   ;;  %v436_v18 = vperm.slane %v1261_v14, 0  ;;  %v437_v19 = vperm.slane %v1261_v14, 4  ;;  %v442_v22 = vperm.slane %v1261_v14, 1  ;;  %v443_v23 = vperm.slane %v1261_v14, 5  ;;  %v461_v59 = vld [vmem:[%s1436_s3] sm:$0xff]  ;;  %s1091_s30 = smov 112  }
  0x29   : > { %vm478_vm0 = vcmp.lt.s32.totalorder %v1263_v17, 1  ;;  %vm487_vm1 = vcmp.lt.s32.totalorder %v1263_v17, 127  ;;  %vm570_vm2 = vcmp.lt.s32.totalorder %v1263_v17, 16  ;;  %vm581_vm3 = vcmp.lt.s32.totalorder %v1263_v17, 112  ;;  %v469_v17 = vld [vmem:[%s1444_s11] sm:$0x1f] }
  0x2a   : > { %v1268_v20 = vperm.slane %v436_v18, 0  ;;  %v1270_v21 = vperm.slane %v437_v19, 0  ;;  %v1281_v31 = vperm.slane %v442_v22, 1  ;;  %v1283_v32 = vperm.slane %v443_v23, 1  ;;  %p429_p6 = scmp.lt.s32.totalorder %s1176_s25, 1 }
  0x2b   : > { %vm595_vm4 = vcmask 64512  }
  0x2c   : > { %s1461_s25 = smov (!%p429_p6, %s1176_s25), 1 }
  0x2d   : > { %s939_s17 = sshll.u32 %s1461_s25, 4 }
  0x2e   : > { %s433_s19 = scalar_lea.vmem %s1445_s12, %s939_s17 }
  0x2f   : > { %485 = vrot.lane.b32.xlu1 %v1244_v5, %s1082_s26 }
  0x30   : > { %474 = vrot.lane.b32.xlu0 %v1244_v5, %s1083_s29  ;;  %993 = vset.pattern.permute.xlu2 %v1084_v6 }
  0x31   : > { %500 = vperm.xlu2 %993, %v460_v4  }
  0x37   : > { %538 = vperm.xlu1 %995, %v460_v4  }
  0x38   : > { %508 = vperm.xlu0 %994, %v460_v4  }
  0x39   : > { %996 = vset.pattern.permute.xlu2 %v1085_v7 }
  0x3a   : > { %544 = vperm.xlu2 %996, %v460_v4  }
  0x3f   : > { %997 = vset.pattern.permute.xlu1 %v1086_v8 }
  0x40   : > { %999 = vset.pattern.permute.xlu0 %v1087_v9  ;;  %552 = vperm.xlu1 %997, %v460_v4  }
  0x41   : > { %522 = vperm.xlu0 %999, %v460_v4  }
  0x42   : > { %998 = vset.pattern.permute.xlu2 %v1088_v10 }
  0x43   : > { %516 = vperm.xlu2 %998, %v460_v4  }
  0x48   : > { %1000 = vset.pattern.permute.xlu1 %v1089_v11 }
  0x49   : > { %1004 = vset.pattern.permute.xlu0 %v1081_v2  ;;  %530 = vperm.xlu1 %1000, %v460_v4  }
  0x4b   : > { %1001 = vset.pattern.permute.xlu2 %v1079_v0 }
  0x51   : > { %1002 = vset.pattern.permute.xlu1 %v1079_v0 }
  0x82   : > { %v495_v13 = vpop.permute.xlu2 %494 }
  0x8b   : > { %v501_v28 = vpop.permute.xlu2 %500 }
  0x8c   : > { %v503_v35 = vmul.f32 %v501_v28, %v1235_v3  ;;  %v504_v36 = vmul.f32 %v501_v28, %v1244_v5 }
  0x94   : > { %v545_v49 = vpop.permute.xlu2 %544 }
  0x95   : > { %v547_v50 = vmul.f32 %v545_v49, %v1235_v3  ;;  %v548_v51 = vmul.f32 %v545_v49, %v1244_v5 }
  0x99   : > { %v484_v15 = vpop.permute.xlu1 %483 }
  0x9a   : > { %v473_v16 = vpop.permute.xlu0 %472 }
  0x9d   : > { %v517_v63 = vpop.permute.xlu2 %516 }
  0xa1   : > { %v486_v24 = vpop.permute.xlu1 %485 }
  0xa2   : > { %v475_v25 = vpop.permute.xlu0 %474  ;;  %v488_v33 = vsel %vm487_vm1, %v484_v15, %v486_v24  ;;  %v489_v34 = vsel %vm487_vm1, %v486_v24, %v484_v15 }
  0xa3   : > { %v479_v26 = vsel %vm478_vm0, %v473_v16, %v475_v25  ;;  %v480_v27 = vsel %vm478_vm0, %v475_v25, %v473_v16  ;;  %v490_v39 = vmul.f32 %v488_v33, %v1281_v31  ;;  %v491_v40 = vmul.f32 %v489_v34, %v1283_v32  ;;  %v463_v16 = vld [vmem:[%s1438_s5] sm:$0xff] }
  0xa4   : > { %v481_v29 = vmul.f32 %v480_v27, %v1268_v20  ;;  %v482_v30 = vmul.f32 %v479_v26, %v1270_v21  ;;  %v448_v26 = vperm.slane %v1261_v14, 2  ;;  %v449_v27 = vperm.slane %v1261_v14, 6 }
  0xa5   : > { %v455_v33 = vperm.slane %v1261_v14, 7 }
  0xa6   : > { %v497_v37 = vmul.f32 %v495_v13, %v481_v29  ;;  %v498_v38 = vmul.f32 %v495_v13, %v482_v30  ;;  %v519_v12 = vmul.f32 %v517_v63, %v481_v29  ;;  %v520_v13 = vmul.f32 %v517_v63, %v482_v30 }
  0xa8   : > { %v505_v43 = vadd.f32 %v503_v35, %v497_v37  ;;  %v506_v44 = vadd.f32 %v504_v36, %v498_v38  ;;  %v1331_v38 = vperm.slane %v455_v33, 3 }
  0xa9   : > { %v539_v41 = vpop.permute.xlu1 %538 }
  0xaa   : > { %v509_v42 = vpop.permute.xlu0 %508  ;;  %v541_v52 = vmul.f32 %v539_v41, %v481_v29  ;;  %v542_v53 = vmul.f32 %v539_v41, %v482_v30  ;;  %v1316_v29 = vperm.slane %v448_v26, 2  ;;  %v454_v30 = vperm.slane %v1261_v14, 3 }
  0xab   : > { %v511_v45 = vmul.f32 %v509_v42, %v490_v39  ;;  %v512_v46 = vmul.f32 %v509_v42, %v491_v40 }
  0xac   : > { %v549_v55 = vadd.f32 %v547_v50, %v541_v52  ;;  %v550_v56 = vadd.f32 %v548_v51, %v542_v53  ;;  %v1329_v37 = vperm.slane %v454_v30, 3  ;;  %v462_v52 = vld [vmem:[%s1437_s4] sm:$0xff] }
  0xad   : > { %v513_v47 = vadd.f32 %v511_v45, %v505_v43  ;;  %v514_v48 = vadd.f32 %v512_v46, %v506_v44 }
  0xaf   : > { %568 = vrot.lane.b32.xlu1 %v514_v48, %s1090_s27  ;;  %566 = vrot.lane.b32.xlu2 %v513_v47, %s1090_s27 }
  0xb2   : > { %v553_v54 = vpop.permute.xlu1 %552 }
  0xb3   : > { %v555_v57 = vmul.f32 %v553_v54, %v490_v39  ;;  %v556_v58 = vmul.f32 %v553_v54, %v491_v40  ;;  %v523_v62 = vpop.permute.xlu0 %522 }
  0xb4   : > { %v525_v2 = vmul.f32 %v523_v62, %v1235_v3  ;;  %v526_v4 = vmul.f32 %v523_v62, %v1244_v5  ;;  %v464_v3 = vld [vmem:[%s1439_s6] sm:$0xff] }
  0xb5   : > { %v557_v60 = vadd.f32 %v555_v57, %v549_v55  ;;  %v558_v61 = vadd.f32 %v556_v58, %v550_v56 }
  0xb6   : > { %v527_v18 = vadd.f32 %v525_v2, %v519_v12  ;;  %v528_v19 = vadd.f32 %v526_v4, %v520_v13 }
  0xb7   : > { %561 = vperm.xlu2 %1001, %v461_v59   ;;  %579 = vrot.lane.b32.xlu1 %v558_v61, %s1091_s30 }
  0xb8   : > { %577 = vrot.lane.b32.xlu0 %v557_v60, %s1091_s30 }
  0xbb   : > { %v531_v15 = vpop.permute.xlu1 %530 }
  0xbc   : > { %v533_v22 = vmul.f32 %v531_v15, %v490_v39  ;;  %v534_v23 = vmul.f32 %v531_v15, %v491_v40 }
  0xbe   : > { %v535_v24 = vadd.f32 %v533_v22, %v527_v18  ;;  %v536_v25 = vadd.f32 %v534_v23, %v528_v19 }
  0xbf   : > { %592 = vperm.xlu2 %1001, %v463_v16   ;;  %659 = vperm.xlu1 %1002, %v464_v3  }
  0xc7   : > { %1003 = vset.pattern.permute.xlu2 %v1084_v6  ;;  %1005 = vset.pattern.permute.xlu1 %v1080_v1  ;;  %v1318_v6 = vperm.slane %v449_v27, 2 }
  0xc8   : > { %665 = vperm.xlu2 %1003, %v464_v3  }
  0xd0   : > { %1006 = vset.pattern.permute.xlu2 %v1085_v7 }
 0x109   : > { %v567_v5 = vpop.permute.xlu2 %566 }
 0x111   : > { %v562_v34 = vpop.permute.xlu2 %561 }
 0x112   : > { %v564_v39 = vadd.f32 %v562_v34, %v535_v24  ;;  %v565_v40 = vadd.f32 %v562_v34, %v536_v25 }
 0x119   : > { %v593_v53 = vpop.permute.xlu2 %592 }
 0x121   : > { %v569_v28 = vpop.permute.xlu1 %568 }
 0x122   : > { %v571_v1 = vsel %vm570_vm2, %v567_v5, %v569_v28  ;;  %v572_v7 = vsel %vm570_vm2, %v569_v28, %v567_v5  ;;  %v666_v61 = vpop.permute.xlu2 %665 }
 0x123   : > { %v573_v35 = vmul.f32 %v572_v7, %v1316_v29  ;;  %v574_v36 = vmul.f32 %v571_v1, %v1318_v6 }
 0x125   : > { %v575_v44 = vadd.f32 %v573_v35, %v564_v39  ;;  %v576_v46 = vadd.f32 %v574_v36, %v565_v40 }
 0x129   : > { %v580_v14 = vpop.permute.xlu1 %579 }
 0x12a   : > { %v578_v41 = vpop.permute.xlu0 %577 }
 0x12b   : > { %v582_v42 = vsel %vm581_vm3, %v578_v41, %v580_v14  ;;  %v583_v43 = vsel %vm581_vm3, %v580_v14, %v578_v41 }
 0x12c   : > { %v584_v45 = vmul.f32 %v582_v42, %v1329_v37  ;;  %v585_v47 = vmul.f32 %v583_v43, %v1331_v38 }
 0x12e   : > { %v586_v48 = vadd.f32 %v584_v45, %v575_v44  ;;  %v587_v49 = vadd.f32 %v585_v47, %v576_v46  ;;  %v465_v47 = vld [vmem:[%s1440_s7] sm:$0xff] }
 0x130   : > { %v588_v50 = vmax.f32 %v586_v48, 0.0  ;;  %v589_v51 = vmax.f32 %v587_v49, 0.0 }
 0x131   : > { %v660_v60 = vpop.permute.xlu1 %659 }
 0x132   : > { %614 = vmatpush.msra.mxu0 %v588_v50  ;;  %634 = vmatpush.msra.mxu1 %v589_v51 }
 0x133   : > { %930 = vmatmul.msk.f32.vlgmr.msra.gmra.mxu0 %vm595_vm4, %v462_v52  ;;  %931 = vmatmul.msk.f32.vlgmr.msra.gmra.mxu1 %vm595_vm4, %v462_v52 }
 0x1b0   : > { %v616_v54 = vpop.f32.mrf.mxu0  ;;  %v636_v55 = vpop.f32.mrf.mxu1 }
 0x1b1   : > { %v617_v56 = vadd.f32 %v616_v54, %v593_v53  ;;  %v637_v57 = vadd.f32 %v636_v55, %v593_v53  ;;  %v467_v53 = vld [vmem:[%s1442_s9] sm:$0xff] }
 0x1b3   : > { %v1344_v58 = vmax.f32 %v617_v56, 0.0  ;;  %v1346_v59 = vmax.f32 %v637_v57, 0.0 }
 0x1b5   : > { %643 = vrot.lane.b32.xlu1 %v1346_v59, %s1083_s29  ;;  %649 = vrot.lane.b32.xlu2 %v1344_v58, %s1082_s26  ;;  %v668_v22 = vmul.f32 %v666_v61, %v1344_v58  ;;  %v669_v23 = vmul.f32 %v666_v61, %v1346_v59 }
 0x1b6   : > { %641 = vrot.lane.b32.xlu0 %v1344_v58, %s1083_s29 }
 0x1bd   : > { %703 = vperm.xlu1 %1005, %v464_v3   ;;  %709 = vperm.xlu2 %1006, %v464_v3  }
 0x1be   : > { %651 = vrot.lane.b32.xlu0 %v1346_v59, %s1082_s26 }
 0x1c5   : > { %1007 = vset.pattern.permute.xlu1 %v1086_v8  ;;  %1008 = vset.pattern.permute.xlu2 %v1088_v10 }
 0x1c6   : > { %673 = vperm.xlu0 %1004, %v464_v3   ;;  %717 = vperm.xlu1 %1007, %v464_v3  }
 0x1c7   : > { %681 = vperm.xlu2 %1008, %v464_v3  }
 0x1ce   : > { %1009 = vset.pattern.permute.xlu0 %v1087_v9  ;;  %1010 = vset.pattern.permute.xlu1 %v1089_v11 }
 0x1cf   : > { %687 = vperm.xlu0 %1009, %v464_v3   ;;  %695 = vperm.xlu1 %1010, %v464_v3  }
 0x1d0   : > { %1011 = vset.pattern.permute.xlu2 %v1079_v0 }
 0x1d7   : > { %1012 = vset.pattern.permute.xlu0 %v1079_v0 }
 0x20f   : > { %v650_v8 = vpop.permute.xlu2 %649 }
 0x217   : > { %v710_v13 = vpop.permute.xlu2 %709 }
 0x218   : > { %v712_v24 = vmul.f32 %v710_v13, %v1344_v58 }
 0x221   : > { %v682_v36 = vpop.permute.xlu2 %681 }
 0x227   : > { %v644_v62 = vpop.permute.xlu1 %643 }
 0x228   : > { %v642_v63 = vpop.permute.xlu0 %641 }
 0x229   : > { %v645_v10 = vsel %vm478_vm0, %v642_v63, %v644_v62  ;;  %v646_v2 = vsel %vm478_vm0, %v644_v62, %v642_v63 }
 0x22a   : > { %v647_v11 = vmul.f32 %v646_v2, %v1268_v20  ;;  %v648_v4 = vmul.f32 %v645_v10, %v1270_v21 }
 0x22c   : > { %v662_v15 = vmul.f32 %v660_v60, %v647_v11  ;;  %v663_v0 = vmul.f32 %v660_v60, %v648_v4  ;;  %v684_v39 = vmul.f32 %v682_v36, %v647_v11  ;;  %v685_v40 = vmul.f32 %v682_v36, %v648_v4 }
 0x22e   : > { %v670_v3 = vadd.f32 %v668_v22, %v662_v15  ;;  %v671_v5 = vadd.f32 %v669_v23, %v663_v0  ;;  %v466_v0 = vld [vmem:[%s1441_s8] sm:$0xff] }
 0x22f   : > { %v704_v9 = vpop.permute.xlu1 %703 }
 0x230   : > { %v652_v12 = vpop.permute.xlu0 %651  ;;  %v706_v19 = vmul.f32 %v704_v9, %v647_v11  ;;  %v707_v35 = vmul.f32 %v704_v9, %v648_v4 }
 0x231   : > { %v653_v16 = vsel %vm487_vm1, %v650_v8, %v652_v12  ;;  %v654_v18 = vsel %vm487_vm1, %v652_v12, %v650_v8 }
 0x232   : > { %v655_v20 = vmul.f32 %v653_v16, %v1281_v31  ;;  %v656_v21 = vmul.f32 %v654_v18, %v1283_v32  ;;  %v714_v27 = vadd.f32 %v712_v24, %v706_v19  ;;  %v713_v31 = vmul.f32 %v710_v13, %v1346_v59  ;;  %v468_v24 = vld [vmem:[%s1443_s10] sm:$0x1f] }
 0x234   : > { %v715_v14 = vadd.f32 %v713_v31, %v707_v35 }
 0x238   : > { %v674_v25 = vpop.permute.xlu0 %673  ;;  %v718_v26 = vpop.permute.xlu1 %717 }
 0x239   : > { %v676_v28 = vmul.f32 %v674_v25, %v655_v20  ;;  %v677_v30 = vmul.f32 %v674_v25, %v656_v21  ;;  %v720_v33 = vmul.f32 %v718_v26, %v655_v20  ;;  %v721_v32 = vmul.f32 %v718_v26, %v656_v21 }
 0x23b   : > { %v678_v1 = vadd.f32 %v676_v28, %v670_v3  ;;  %v679_v7 = vadd.f32 %v677_v30, %v671_v5  ;;  %v722_v34 = vadd.f32 %v720_v33, %v714_v27  ;;  %v723_v48 = vadd.f32 %v721_v32, %v715_v14 }
 0x23d   : > { %733 = vrot.lane.b32.xlu1 %v679_v7, %s1090_s27  ;;  %731 = vrot.lane.b32.xlu2 %v678_v1, %s1090_s27 }
 0x23e   : > { %741 = vrot.lane.b32.xlu0 %v722_v34, %s1091_s30 }
 0x241   : > { %v688_v41 = vpop.permute.xlu0 %687  ;;  %v696_v42 = vpop.permute.xlu1 %695 }
 0x242   : > { %v690_v43 = vmul.f32 %v688_v41, %v1344_v58  ;;  %v691_v44 = vmul.f32 %v688_v41, %v1346_v59  ;;  %v698_v45 = vmul.f32 %v696_v42, %v655_v20  ;;  %v699_v46 = vmul.f32 %v696_v42, %v656_v21 }
 0x244   : > { %v692_v49 = vadd.f32 %v690_v43, %v684_v39  ;;  %v693_v50 = vadd.f32 %v691_v44, %v685_v40 }
 0x245   : > { %726 = vperm.xlu2 %1011, %v465_v47   ;;  %743 = vrot.lane.b32.xlu1 %v723_v48, %s1091_s30 }
 0x246   : > { %v700_v51 = vadd.f32 %v698_v45, %v692_v49  ;;  %v701_v52 = vadd.f32 %v699_v46, %v693_v50  ;;  %805 = vperm.xlu0 %1012, %v469_v17  }
 0x24d   : > { %755 = vperm.xlu2 %1011, %v467_v53  }
 0x297   : > { %v732_v54 = vpop.permute.xlu2 %731 }
 0x29f   : > { %v727_v58 = vpop.permute.xlu2 %726 }
 0x2a0   : > { %v729_v61 = vadd.f32 %v727_v58, %v700_v51  ;;  %v730_v62 = vadd.f32 %v727_v58, %v701_v52 }
 0x2af   : > { %v734_v55 = vpop.permute.xlu1 %733 }
 0x2b0   : > { %v735_v56 = vsel %vm570_vm2, %v732_v54, %v734_v55  ;;  %v736_v57 = vsel %vm570_vm2, %v734_v55, %v732_v54  ;;  %v742_v63 = vpop.permute.xlu0 %741 }
 0x2b1   : > { %v737_v59 = vmul.f32 %v736_v57, %v1316_v29  ;;  %v738_v60 = vmul.f32 %v735_v56, %v1318_v6 }
 0x2b3   : > { %v739_v9 = vadd.f32 %v737_v59, %v729_v61  ;;  %v740_v4 = vadd.f32 %v738_v60, %v730_v62 }
 0x2b7   : > { %v744_v8 = vpop.permute.xlu1 %743 }
 0x2b8   : > { %v745_v10 = vsel %vm581_vm3, %v742_v63, %v744_v8  ;;  %v746_v2 = vsel %vm581_vm3, %v744_v8, %v742_v63  ;;  %v806_v20 = vpop.permute.xlu0 %805 }
 0x2b9   : > { %v747_v11 = vmul.f32 %v745_v10, %v1329_v37  ;;  %v748_v12 = vmul.f32 %v746_v2, %v1331_v38  ;;  %v756_v37 = vpop.permute.xlu2 %755 }
 0x2bb   : > { %v749_v13 = vadd.f32 %v747_v11, %v739_v9  ;;  %v750_v29 = vadd.f32 %v748_v12, %v740_v4 }
 0x2bd   : > { %v751_v15 = vmax.f32 %v749_v13, 0.0  ;;  %v752_v6 = vmax.f32 %v750_v29, 0.0 }
 0x2bf   : > { %776 = vmatpush.msra.mxu2 %v751_v15  ;;  %796 = vmatpush.msra.mxu3 %v752_v6 }
 0x2c0   : > { %932 = vmatmul.msk.f32.vlgmr.msra.gmra.mxu2 %vm595_vm4, %v466_v0  ;;  %933 = vmatmul.msk.f32.vlgmr.msra.gmra.mxu3 %vm595_vm4, %v466_v0 }
 0x343   : > { %v778_v38 = vpop.f32.mrf.mxu2  ;;  %v798_v16 = vpop.f32.mrf.mxu3 }
 0x344   : > { %v779_v18 = vadd.f32 %v778_v38, %v756_v37  ;;  %v799_v19 = vadd.f32 %v798_v16, %v756_v37 }
 0x346   : > { %v801_v22 = vmax.f32 %v779_v18, 0.0  ;;  %v802_v23 = vmax.f32 %v799_v19, 0.0 }
 0x348   : > { %826 = vmatpush.msrb.mxu0 %v801_v22  ;;  %846 = vmatpush.msrb.mxu1 %v802_v23 }
 0x349   : > { %934 = vmatmul.msk.f32.vlgmr.msrb.gmra.mxu0 %vm595_vm4, %v468_v24  ;;  %935 = vmatmul.msk.f32.vlgmr.msrb.gmra.mxu1 %vm595_vm4, %v468_v24 }
 0x3c6   : > { %v828_v21 = vpop.f32.mrf.mxu0  ;;  %v848_v25 = vpop.f32.mrf.mxu1 }
 0x3c7   : > { %v829_v3 = vadd.f32 %v828_v21, %v806_v20  ;;  %v849_v5 = vadd.f32 %v848_v25, %v806_v20 }
 0x3c9   : > { %851 = vst [vmem:[%s433_s19] sm:$0x1f] %v829_v3 }
 0x3ca   : > { %852 = vst [vmem:[%s433_s19 + $0x8] sm:$0x1f] %v849_v5 }
 0x3cb PF: > { %s1455_s24 = sld [smem:[#allocation6_spill]]  ;;  %s1458_s21 = smov %s1069_s22 }
 0x3cc   : > { %s1456_s20 = sld [smem:[#allocation5_spill]] }
 0x3cd   : > { %s1457_s23 = sld [smem:[#allocation7_spill]] }
 0x3d1   : > { %p22_p7 = scmp.ge.s32.totalorder %s1455_s24, 4  }
 0x3d2   : > { %s1459_s22 = smov %s1456_s20 }
 0x3d3   :  { %24 = sbr.rel (!%p22_p7) target bundleno = 3 (0x3), region = 108 }
 0x3d8   :  { %874 = vsyncpa [#allocation3], 1 }
 0x3d9   :  { %876 = vsyncpa [#allocation3 + $0x1], 1 }

</bundles_post_ra>
